<compile_context>
chip_gen: v7x
topology: tpu7x:2x2x1
jax: 0.10.0
libtpu: 0.0.40
codegen_flags: <defaults>
</compile_context>

<pallas_src>
import functools

import jax
import jax.numpy as jnp
from jax import lax
from jax.experimental import pallas as pl
from jax.experimental.pallas import tpu as pltpu


def _roberta_output_kernel(x_ref, w_ref, b_ref, res_ref, g_ref, bb_ref, o_ref,
                           *, eps, matmul_dtype):
    # x_ref: (tm, I)   w_ref: (I, H) resident   b/g/bb: (1, H)   res/o: (tm, H)
    x = x_ref[...]
    w = w_ref[...]
    if matmul_dtype is not None:
        # bf16 operands for the MXU fast path; accumulate in f32.
        x = x.astype(matmul_dtype)
        w = w.astype(matmul_dtype)
    acc = jnp.dot(x, w, preferred_element_type=jnp.float32)
    acc = acc + b_ref[...].astype(jnp.float32)
    # TODO(synk): nn.Dropout is identity at inference; a training-mode variant
    # would build the keep mask here with pltpu.prng_seed + pltpu.prng_random_bits.
    acc = acc + res_ref[...].astype(jnp.float32)

    # LayerNorm over the full hidden dim. tn == H, so the reduction never sees
    # padding; a ragged edge M-tile only produces garbage *rows*, which the
    # masked store of the output block drops.
    mean = jnp.mean(acc, axis=-1, keepdims=True)
    centered = acc - mean
    var = jnp.mean(centered * centered, axis=-1, keepdims=True)
    y = centered * lax.rsqrt(var + eps)
    y = y * g_ref[...].astype(jnp.float32) + bb_ref[...].astype(jnp.float32)
    o_ref[...] = y.astype(o_ref.dtype)


@functools.partial(jax.jit, static_argnames=("eps", "tm", "matmul_dtype"))
def roberta_output(hidden_states, input_tensor, weight, bias, ln_weight, ln_bias,
                   *, eps=1e-5, tm=None, matmul_dtype=None):
    """hidden_states: (B,S,I); input_tensor: (B,S,H); weight: (I,H) -> (B,S,H)."""
    B, S, I = hidden_states.shape
    H = input_tensor.shape[-1]
    M = B * S

    if tm is None:
        # Row tile: multiple of 8 (sublane), large enough to amortize per-step
        # overhead and feed the 256-wide MXU, small enough that double-buffered
        # x/res/out tiles + the resident weight stay inside v7x's 64 MiB VMEM.
        tm = min(256, M)

    x2d = hidden_states.reshape(M, I)
    r2d = input_tensor.reshape(M, H)
    b2d = bias.reshape(1, H)
    g2d = ln_weight.reshape(1, H)
    bb2d = ln_bias.reshape(1, H)

    in_bytes = hidden_states.dtype.itemsize
    w_bytes = weight.dtype.itemsize
    # Conservative VMEM budget: weight possibly double-buffered, streamed tiles
    # double-buffered, small padded vectors, plus slack.
    vmem_est = (
        2 * I * H * w_bytes
        + 2 * tm * I * in_bytes
        + 2 * tm * H * in_bytes
        + 2 * tm * H * in_bytes
        + 3 * 8 * max(H, 128) * 4
        + (1 << 20)
    )
    vmem_limit = int(min(max(vmem_est, 16 << 20), 100 << 20))

    cost = pl.CostEstimate(
        flops=2 * M * I * H + 8 * M * H,
        transcendentals=M,  # one rsqrt per row
        bytes_accessed=(M * I + 2 * M * H) * in_bytes + I * H * w_bytes,
    )

    out = pl.pallas_call(
        functools.partial(_roberta_output_kernel, eps=eps, matmul_dtype=matmul_dtype),
        out_shape=jax.ShapeDtypeStruct((M, H), hidden_states.dtype),
        grid_spec=pltpu.PrefetchScalarGridSpec(
            num_scalar_prefetch=0,
            grid=(pl.cdiv(M, tm),),
            in_specs=[
                pl.BlockSpec((tm, I), lambda i: (i, 0)),   # activations: streamed
                pl.BlockSpec((I, H), lambda i: (0, 0)),    # weight: resident in VMEM
                pl.BlockSpec((1, H), lambda i: (0, 0)),    # bias: resident
                pl.BlockSpec((tm, H), lambda i: (i, 0)),   # residual: streamed
                pl.BlockSpec((1, H), lambda i: (0, 0)),    # LN gamma: resident
                pl.BlockSpec((1, H), lambda i: (0, 0)),    # LN beta: resident
            ],
            out_specs=pl.BlockSpec((tm, H), lambda i: (i, 0)),
        ),
        compiler_params=pltpu.CompilerParams(
            dimension_semantics=("parallel",),  # v7x: split row tiles across both TCs
            vmem_limit_bytes=vmem_limit,
        ),
        cost_estimate=cost,
    )(x2d, weight, b2d, r2d, g2d, bb2d)
    return out.reshape(B, S, H)


if __name__ == "__main__":
    # Small shapes consistent with the module: hidden_size=32, intermediate_size=128.
    B, S, H, I = 2, 8, 32, 128
    EPS = 1e-5

    key = jax.random.PRNGKey(0)
    k_x, k_r, k_w, k_b, k_g, k_bb = jax.random.split(key, 6)

    hidden = jax.random.normal(k_x, (B, S, I), dtype=jnp.float32)      # intermediate acts
    resid = jax.random.normal(k_r, (B, S, H), dtype=jnp.float32)       # attention output
    w = jax.random.normal(k_w, (I, H), dtype=jnp.float32) * 0.02       # Linear(I->H), stored (I,H)
    b = jax.random.normal(k_b, (H,), dtype=jnp.float32) * 0.02
    gamma = 1.0 + jax.random.normal(k_g, (H,), dtype=jnp.float32) * 0.02
    beta = jax.random.normal(k_bb, (H,), dtype=jnp.float32) * 0.02

    # f32 run (tight check against the plain-JAX reference).
    y = roberta_output(hidden, resid, w, b, gamma, beta, eps=EPS)
    jax.block_until_ready(y)

    # Reference: dense + (dropout=identity) + residual + LayerNorm, all f32.
    pre = hidden @ w + b + resid
    mu = pre.mean(axis=-1, keepdims=True)
    var = ((pre - mu) ** 2).mean(axis=-1, keepdims=True)
    ref = (pre - mu) / jnp.sqrt(var + EPS) * gamma + beta

    assert y.shape == (B, S, H)
    assert jnp.allclose(y, ref, atol=2e-4, rtol=2e-4), "f32 mismatch vs reference"

    # bf16-operand MXU path (f32 accumulation + f32 LayerNorm), loose tolerance.
    y_bf16 = roberta_output(hidden, resid, w, b, gamma, beta, eps=EPS,
                            matmul_dtype=jnp.bfloat16)
    jax.block_until_ready(y_bf16)
    assert jnp.allclose(y_bf16, ref, atol=5e-2, rtol=5e-2), "bf16 mismatch vs reference"

    print("KERNEL_OK")
</pallas_src>

<mosaic_0001>
module attributes {stable_mosaic.version = 11 : i64} {
  func.func @_roberta_output_kernel(%arg0: i32, %arg1: memref<16x128xf32, #tpu.memory_space<vmem>>, %arg2: memref<128x32xf32, #tpu.memory_space<vmem>>, %arg3: memref<1x32xf32, #tpu.memory_space<vmem>>, %arg4: memref<16x32xf32, #tpu.memory_space<vmem>>, %arg5: memref<1x32xf32, #tpu.memory_space<vmem>>, %arg6: memref<1x32xf32, #tpu.memory_space<vmem>>, %arg7: memref<16x32xf32, #tpu.memory_space<vmem>>) attributes {dimension_semantics = [#tpu.dimension_semantics<parallel>], iteration_bounds = array<i64: 1>, scalar_prefetch = 0 : i64, scratch_operands = 0 : i64, tpu.core_type = #tpu.core_type<tc>, window_params = [{transform_indices = @transform_0, window_bounds = array<i64: 16, 128>}, {pipeline_mode = #tpu.pipeline_mode<synchronous>, transform_indices = @transform_1, window_bounds = array<i64: 128, 32>}, {pipeline_mode = #tpu.pipeline_mode<synchronous>, transform_indices = @transform_2, window_bounds = array<i64: 1, 32>}, {transform_indices = @transform_3, window_bounds = array<i64: 16, 32>}, {pipeline_mode = #tpu.pipeline_mode<synchronous>, transform_indices = @transform_4, window_bounds = array<i64: 1, 32>}, {pipeline_mode = #tpu.pipeline_mode<synchronous>, transform_indices = @transform_5, window_bounds = array<i64: 1, 32>}, {transform_indices = @transform_6, window_bounds = array<i64: 16, 32>}]} {
    %c0 = arith.constant 0 : index
    %c0_0 = arith.constant 0 : index
    %0 = vector.load %arg1[%c0, %c0_0] : memref<16x128xf32, #tpu.memory_space<vmem>>, vector<16x128xf32>
    %c0_1 = arith.constant 0 : index
    %c0_2 = arith.constant 0 : index
    %1 = vector.load %arg2[%c0_1, %c0_2] : memref<128x32xf32, #tpu.memory_space<vmem>>, vector<128x32xf32>
    %cst = arith.constant dense<0.000000e+00> : vector<16x32xf32>
    %2 = tpu.matmul %0, %1, %cst {dimension_numbers = #tpu.dot_dimension_numbers<[1], [0], [0], [1], [0, 0, 1, 1], [], []>} : vector<16x128xf32>, vector<128x32xf32>, vector<16x32xf32> -> vector<16x32xf32>
    %c0_3 = arith.constant 0 : index
    %c0_4 = arith.constant 0 : index
    %3 = vector.load %arg3[%c0_3, %c0_4] : memref<1x32xf32, #tpu.memory_space<vmem>>, vector<1x32xf32>
    %4 = vector.broadcast %3 : vector<1x32xf32> to vector<16x32xf32>
    %5 = arith.addf %2, %4 : vector<16x32xf32>
    %c0_5 = arith.constant 0 : index
    %c0_6 = arith.constant 0 : index
    %6 = vector.load %arg4[%c0_5, %c0_6] : memref<16x32xf32, #tpu.memory_space<vmem>>, vector<16x32xf32>
    %7 = arith.addf %5, %6 : vector<16x32xf32>
    %cst_7 = arith.constant dense<0.000000e+00> : vector<16xf32>
    %8 = vector.multi_reduction <add>, %7, %cst_7 [1] : vector<16x32xf32> to vector<16xf32>
    %9 = vector.shape_cast %8 : vector<16xf32> to vector<16x1xf32>
    %cst_8 = arith.constant 3.200000e+01 : f32
    %10 = vector.broadcast %cst_8 : f32 to vector<16x1xf32>
    %11 = arith.divf %9, %10 : vector<16x1xf32>
    %12 = vector.broadcast %11 : vector<16x1xf32> to vector<16x32xf32>
    %13 = arith.subf %7, %12 : vector<16x32xf32>
    %14 = arith.mulf %13, %13 : vector<16x32xf32>
    %cst_9 = arith.constant dense<0.000000e+00> : vector<16xf32>
    %15 = vector.multi_reduction <add>, %14, %cst_9 [1] : vector<16x32xf32> to vector<16xf32>
    %16 = vector.shape_cast %15 : vector<16xf32> to vector<16x1xf32>
    %cst_10 = arith.constant 3.200000e+01 : f32
    %17 = vector.broadcast %cst_10 : f32 to vector<16x1xf32>
    %18 = arith.divf %16, %17 : vector<16x1xf32>
    %cst_11 = arith.constant 9.99999974E-6 : f32
    %19 = vector.broadcast %cst_11 : f32 to vector<16x1xf32>
    %20 = arith.addf %18, %19 : vector<16x1xf32>
    %21 = math.rsqrt %20 : vector<16x1xf32>
    %22 = vector.broadcast %21 : vector<16x1xf32> to vector<16x32xf32>
    %23 = arith.mulf %13, %22 : vector<16x32xf32>
    %c0_12 = arith.constant 0 : index
    %c0_13 = arith.constant 0 : index
    %24 = vector.load %arg5[%c0_12, %c0_13] : memref<1x32xf32, #tpu.memory_space<vmem>>, vector<1x32xf32>
    %25 = vector.broadcast %24 : vector<1x32xf32> to vector<16x32xf32>
    %26 = arith.mulf %23, %25 : vector<16x32xf32>
    %c0_14 = arith.constant 0 : index
    %c0_15 = arith.constant 0 : index
    %27 = vector.load %arg6[%c0_14, %c0_15] : memref<1x32xf32, #tpu.memory_space<vmem>>, vector<1x32xf32>
    %28 = vector.broadcast %27 : vector<1x32xf32> to vector<16x32xf32>
    %29 = arith.addf %26, %28 : vector<16x32xf32>
    %c0_16 = arith.constant 0 : index
    %c0_17 = arith.constant 0 : index
    %30 = vector.load %arg7[%c0_16, %c0_17] : memref<16x32xf32, #tpu.memory_space<vmem>>, vector<16x32xf32>
    tpu.vector_store %arg7[%c0_16, %c0_17], %29 {strides = array<i32>} : memref<16x32xf32, #tpu.memory_space<vmem>>, vector<16x32xf32>,
    return
  }
  func.func @transform_0(%arg0: i32) -> (i32, i32) {
    %c0_i32 = arith.constant 0 : i32
    %c0_i32_0 = arith.constant 0 : i32
    return %arg0, %c0_i32 : i32, i32
  }
  func.func @transform_1(%arg0: i32) -> (i32, i32) {
    %c0_i32 = arith.constant 0 : i32
    %c0_i32_0 = arith.constant 0 : i32
    %c0_i32_1 = arith.constant 0 : i32
    return %c0_i32, %c0_i32_0 : i32, i32
  }
  func.func @transform_2(%arg0: i32) -> (i32, i32) {
    %c0_i32 = arith.constant 0 : i32
    %c0_i32_0 = arith.constant 0 : i32
    %c0_i32_1 = arith.constant 0 : i32
    return %c0_i32, %c0_i32_0 : i32, i32
  }
  func.func @transform_3(%arg0: i32) -> (i32, i32) {
    %c0_i32 = arith.constant 0 : i32
    %c0_i32_0 = arith.constant 0 : i32
    return %arg0, %c0_i32 : i32, i32
  }
  func.func @transform_4(%arg0: i32) -> (i32, i32) {
    %c0_i32 = arith.constant 0 : i32
    %c0_i32_0 = arith.constant 0 : i32
    %c0_i32_1 = arith.constant 0 : i32
    return %c0_i32, %c0_i32_0 : i32, i32
  }
  func.func @transform_5(%arg0: i32) -> (i32, i32) {
    %c0_i32 = arith.constant 0 : i32
    %c0_i32_0 = arith.constant 0 : i32
    %c0_i32_1 = arith.constant 0 : i32
    return %c0_i32, %c0_i32_0 : i32, i32
  }
  func.func @transform_6(%arg0: i32) -> (i32, i32) {
    %c0_i32 = arith.constant 0 : i32
    %c0_i32_0 = arith.constant 0 : i32
    return %arg0, %c0_i32 : i32, i32
  }
}

</mosaic_0001>

<bundles_post_ra>
// kernel: roberta_output.1
= control target key start
LH: loop header
LB: loop body
LE: loop exit
PB: predicated region body
PF: predicated region fallthrough
CT: control target
= control target key end

     0   :  { %s436_s0 = inlined_call_operand.vmem [shape: f32[16,128], index: 0, kind: input, shape index: {}]   ;;  %s437_s1 = inlined_call_operand.vmem [shape: f32[128,32], index: 1, kind: input, shape index: {}]   ;;  %s438_s2 = inlined_call_operand.vmem [shape: f32[1,32], index: 2, kind: input, shape index: {}]   ;;  %s439_s3 = inlined_call_operand.vmem [shape: f32[16,32], index: 3, kind: input, shape index: {}]   ;;  %s440_s4 = inlined_call_operand.vmem [shape: f32[1,32], index: 4, kind: input, shape index: {}]   ;;  %s441_s5 = inlined_call_operand.vmem [shape: f32[1,32], index: 5, kind: input, shape index: {}]   ;;  %s442_s6 = inlined_call_operand.hbm [shape: f32[16,32], index: 6, kind: output, shape index: {}]  }
   0x1   :  { %v26_v0 = vld [vmem:[%s437_s1] sm:$0xff]  ;;  %v27_v1 = vld [vmem:[%s437_s1 + $0x8] sm:$0xff]  ;;  %v28_v2 = vld [vmem:[%s437_s1 + $0x10] sm:$0xff] }
   0x2   :  { %v248_v3 = vpack.c.bf16 %v27_v1, %v26_v0  ;;  %v29_v4 = vld [vmem:[%s437_s1 + $0x18] sm:$0xff]  ;;  %v30_v6 = vld [vmem:[%s437_s1 + $0x20] sm:$0xff]  ;;  %v31_v7 = vld [vmem:[%s437_s1 + $0x28] sm:$0xff] }
   0x3   :  { %v252_v5 = vpack.c.bf16 %v29_v4, %v28_v2  ;;  %v256_v8 = vpack.c.bf16 %v31_v7, %v30_v6  ;;  %v24_v9 = vld [vmem:[%s436_s0] sm:$0xff]  ;;  %v32_v10 = vld [vmem:[%s437_s1 + $0x30] sm:$0xff]  ;;  %v33_v11 = vld [vmem:[%s437_s1 + $0x38] sm:$0xff] }
   0x4   :  { %249 = vmatprep.subr.bf16.mxu0 %v248_v3  ;;  %245 = vmatprep.mubr.f32.mxu0 %v24_v9 }
   0x5   :  { %251 = vmatpush3.bf16.msra.mxu0 %v248_v3 }
   0x6   :  { %253 = vmatprep.subr.bf16.mxu0 %v252_v5 }
   0x7   :  { %11 = vsyncpa [#allocation3], 0  ;;  %v260_v12 = vpack.c.bf16 %v33_v11, %v32_v10  ;;  %v34_v13 = vld [vmem:[%s437_s1 + $0x40] sm:$0xff]  ;;  %v35_v14 = vld [vmem:[%s437_s1 + $0x48] sm:$0xff]  ;;  %vm128_vm0 = vcmask 261120   ;;  %s311_s15 = smov [#allocation2]  }
   0x8   :  { %v264_v15 = vpack.c.bf16 %v35_v14, %v34_v13  ;;  %v36_v16 = vld [vmem:[%s437_s1 + $0x50] sm:$0xff]  ;;  %v37_v17 = vld [vmem:[%s437_s1 + $0x58] sm:$0xff]  ;;  %v38_v19 = vld [vmem:[%s437_s1 + $0x60] sm:$0xff]  ;;  %s181_s16 = sshll.u32 %s311_s15, 4  ;;  %s182_s16 = int_to_ptr.vmem [resolvable:$true] %s181_s16 }
   0x9   :  { %255 = vmatpush3.bf16.msra.mxu0 %v252_v5  ;;  %v268_v18 = vpack.c.bf16 %v37_v17, %v36_v16  ;;  %v39_v20 = vld [vmem:[%s437_s1 + $0x68] sm:$0xff]  ;;  %v40_v22 = vld [vmem:[%s437_s1 + $0x70] sm:$0xff]  ;;  %v41_v23 = vld [vmem:[%s437_s1 + $0x78] sm:$0xff]  ;;  %s287_s17 = scalar_lea.vmem %s182_s16, 256  ;;  %p292_p1 = scmp.lt.s32.totalorder %s182_s16, %s182_s16 }
   0xa   :  { %257 = vmatprep.subr.bf16.mxu0 %v256_v8  ;;  %v272_v21 = vpack.c.bf16 %v39_v20, %v38_v19  ;;  %v276_v24 = vpack.c.bf16 %v41_v23, %v40_v22  ;;  %v25_v25 = vld [vmem:[%s436_s0 + $0x8] sm:$0xff]  ;;  %v192_v26 = vld [vmem:[%s438_s2] ss:$0 sm:$0xff]  ;;  %p288_p0 = scmp.ne.s32.totalorder %s182_s16, %s287_s17  ;;  %p293_p2 = scmp.lt.s32.totalorder %s287_s17, %s287_s17 }
   0xb   :  { %v124_v29 = vld [vmem:[%s439_s3] sm:$0xff]  ;;  %v125_v32 = vld [vmem:[%s439_s3 + $0x8] sm:$0xff] }
   0xc   :  { %v193_v54 = vld [vmem:[%s440_s4] ss:$0 sm:$0xff]  ;;  %p294_p3 = por %p293_p2, %p292_p1 }
   0xd   :  { %259 = vmatpush3.bf16.msra.mxu0 %v256_v8  ;;  %v194_v56 = vld [vmem:[%s441_s5] ss:$0 sm:$0xff] }
   0xe   :  { %261 = vmatprep.subr.bf16.mxu0 %v260_v12  ;;  %p295_p4 = pnand %p294_p3, %p288_p0 }
  0x11   :  { %263 = vmatpush3.bf16.msra.mxu0 %v260_v12 }
  0x12   :  { %265 = vmatprep.subr.bf16.mxu0 %v264_v15 }
  0x15   :  { %267 = vmatpush3.bf16.msra.mxu0 %v264_v15 }
  0x16   :  { %269 = vmatprep.subr.bf16.mxu0 %v268_v18 }
  0x19   :  { %271 = vmatpush3.bf16.msra.mxu0 %v268_v18 }
  0x1a   :  { %273 = vmatprep.subr.bf16.mxu0 %v272_v21 }
  0x1d   :  { %275 = vmatpush3.bf16.msra.mxu0 %v272_v21 }
  0x1e   :  { %277 = vmatprep.subr.bf16.mxu0 %v276_v24 }
  0x21   :  { %279 = vmatpush3.bf16.msra.mxu0 %v276_v24 }
  0x24   :  { %246 = vmatmul.mubr.f32.vlgmr.msra.gmra.mrb[0].mxu0 %v25_v25 }
  0xf7   :  { %v247_v27 = vpop.f32.mrb[0].mxu0 }
  0xf8   :  { %v115_v28 = vpop.f32.mrb[1].mxu0  ;;  %v121_v30 = vadd.f32 %v247_v27, %v192_v26 }
  0xf9   :  { %v116_v31 = vadd.f32 %v192_v26, %v115_v28 }
  0xfa   :  { %v127_v35 = vadd.f32 %v125_v32, %v121_v30 }
  0xfb   :  { %v126_v33 = vadd.f32 %v124_v29, %v116_v31 }
  0xfc   :  { %v132_v36 = vsel %vm128_vm0, %v127_v35, 0.0 }
  0xfd   :  { %v129_v34 = vsel %vm128_vm0, %v126_v33, 0.0 }
  0xfe   :  { %130 = vadd.xlane.f32.xlu0 %v129_v34 }
 0x102   :  { %133 = vadd.xlane.f32.xlu0 %v132_v36 }
 0x18b   :  { %v131_v37 = vpop.xlane.xlu0 %130 }
 0x18c   :  { %v136_v38 = vmul.f32 0.03125, %v131_v37 }
 0x18e   :  { %v138_v39 = vsub.f32 %v126_v33, %v136_v38 }
 0x18f   :  { %v134_v40 = vpop.xlane.xlu0 %133 }
 0x190   :  { %v137_v41 = vmul.f32 0.03125, %v134_v40  ;;  %v140_v42 = vmul.f32 %v138_v39, %v138_v39 }
 0x192   :  { %v139_v43 = vsub.f32 %v127_v35, %v137_v41  ;;  %v142_v44 = vsel %vm128_vm0, %v140_v42, 0.0 }
 0x193   :  { %143 = vadd.xlane.f32.xlu1 %v142_v44 }
 0x194   :  { %v141_v45 = vmul.f32 %v139_v43, %v139_v43 }
 0x196   :  { %v145_v46 = vsel %vm128_vm0, %v141_v45, 0.0 }
 0x197   :  { %146 = vadd.xlane.f32.xlu1 %v145_v46 }
 0x220   :  { %v144_v47 = vpop.xlane.xlu1 %143 }
 0x221   :  { %v148_v48 = vmul.f32 0.03125, %v144_v47 }
 0x223   :  { %v150_v49 = vadd.f32 1e-05, %v148_v48 }
 0x224   :  { %v147_v50 = vpop.xlane.xlu1 %146 }
 0x225   :  { %283 = vrsqrt.f32 %v150_v49  ;;  %v149_v51 = vmul.f32 0.03125, %v147_v50 }
 0x227   :  { %v151_v52 = vadd.f32 1e-05, %v149_v51 }
 0x229   :  { %285 = vrsqrt.f32 %v151_v52 }
 0x22f   :  { %v284_v53 = vpop.eup %283 }
 0x230   :  { %v154_v55 = vmul.f32 %v284_v53, %v138_v39 }
 0x232   :  { %v163_v57 = vmul.f32 %v193_v54, %v154_v55 }
 0x233   :  { %v286_v58 = vpop.eup %285 }
 0x234   :  { %v155_v59 = vmul.f32 %v286_v58, %v139_v43  ;;  %v172_v60 = vadd.f32 %v194_v56, %v163_v57 }
 0x236   :  { %v164_v61 = vmul.f32 %v193_v54, %v155_v59  ;;  %174 = vst.msk [vmem:[#allocation2] sm:$0xff] %vm128_vm0, %v172_v60 }
 0x238   :  { %v173_v62 = vadd.f32 %v194_v56, %v164_v61 }
 0x23a   :  { %175 = vst.msk [vmem:[#allocation2 + $0x8] sm:$0xff] %vm128_vm0, %v173_v62 }
 0x23b   :  { %298 = shalt.err (!%p295_p4)
}
 0x23c   :  { %s299_s18 = scalar_lea.hbm %s442_s6, 256 }
 0x23d   :  { %p300_p5 = scmp.ne.s32.totalorder %s442_s6, %s299_s18  ;;  %p303_p6 = scmp.lt.u32.totalorder %s299_s18, %s442_s6 }
 0x23f   :  { %p305_p7 = pnand %p303_p6, %p300_p5 }
 0x241   :  { %308 = shalt.err (!%p305_p7)
}
 0x242   :  { %s312_s23 = smov 128   ;;  %s313_s24 = smov 8  }
 0x243   :  { %187 = dma.vmem_to_hbm [thread:$0]  %s182_s16, 256, %s442_s6, [#allocation3], %s312_s23, %s312_s23, %s313_s24  }
 0x244   :  { %309 = dma.done.wait [#allocation3], 256  }
 0x245   :  { %310 = vsyncadd [#allocation3], 4294967040 }
 0x246   :  { %191 = vsyncpa [#allocation3], 1 }

</bundles_post_ra>
